<compile_context>
chip_gen: v7x
topology: tpu7x:2x2x1
jax: 0.10.0
libtpu: 0.0.40
codegen_flags: <defaults>
</compile_context>

<pallas_src>
import functools
import math

import jax
import jax.numpy as jnp
from jax import lax
from jax.experimental import pallas as pl
from jax.experimental.pallas import tpu as pltpu


def _onehot_kernel(ts_ref, out_ref, *, inv_log_base: float, max_k: int,
                   compute_intervals: bool):
    # ts_ref : (rows, T)      float32  -- batch rows on sublanes, time on lanes
    # out_ref: (k1, rows, T)  out dtype -- lane-dense, class-major one-hot
    ts = ts_ref[...]
    T = ts.shape[-1]

    if compute_intervals:
        # prev[:, t] = ts[:, t-1]; column 0 is masked so itvl[:, 0] == 0.
        if T % 128 == 0:
            prev = pltpu.roll(ts, shift=1, axis=1)   # XLU rotate (otherwise-idle slot)
        else:
            prev = jnp.concatenate([ts[:, :1], ts[:, :-1]], axis=1)
        t_idx = lax.broadcasted_iota(jnp.int32, ts.shape, 1)
        itvl = jnp.where(t_idx == 0, jnp.float32(0.0), ts - prev)
    else:
        itvl = ts

    # log_base(itvl): NaN (negative interval) -> 0; log(0) = -inf survives and
    # clamps to bucket 0, exactly like the torch module.
    res = jnp.log(itvl) * jnp.float32(inv_log_base)       # single VALU multiply
    res = jnp.where(jnp.isnan(res), jnp.float32(0.0), res)
    bucket = jnp.clip(jnp.floor(res), 0.0, float(max_k)).astype(jnp.int32)

    # One dense (rows, T) plane per class: unmasked 128-lane stores straight
    # into the output block, no large iota / broadcast temporaries.
    for c in range(max_k + 1):
        out_ref[c, :, :] = (bucket == c).astype(out_ref.dtype)


def _pick_block_rows(B: int, T: int, k1: int) -> int:
    """Largest row-block that fits a conservative VMEM budget, sublane-aligned,
    leaving >= 2 parallel grid steps when B > 1 (v7x has 2 TensorCores)."""
    k1_pad = ((k1 + 7) // 8) * 8           # output sublane padding (11 -> 16)
    per_row = 4 * T * (2 * 1               # input block, double-buffered
                       + 2 * k1_pad        # output block, double-buffered
                       + 6)                # (rows, T)-sized elementwise temps
    rows = max(1, (10 << 20) // per_row)   # ~10 MiB fits v5e/v6e/v7x defaults
    rows = min(rows, pl.cdiv(B, 2))        # keep >= 2 grid steps when possible
    if rows < B:
        rows = max(8, (rows // 8) * 8)     # sublane-aligned partial blocks
    return min(rows, B)                    # rows == B: full-dim block, always legal


def one_hot_intervals_kmajor(ts2d: jax.Array, *, base: int = 2, max_k: int = 10,
                             compute_intervals: bool = True,
                             block_rows=None, out_dtype=jnp.float32) -> jax.Array:
    """ts2d: [B, T] timestamps (or intervals) -> lane-dense [max_k+1, B, T]."""
    if base <= 1:
        raise ValueError("base should always larger than 1")
    B, T = ts2d.shape
    k1 = max_k + 1
    rows = block_rows if block_rows is not None else _pick_block_rows(B, T, k1)
    rows = max(1, min(int(rows), B))
    if rows < B:
        rows = max(8, (rows // 8) * 8)     # partial blocks must be sublane-aligned

    b_pad = rows * pl.cdiv(B, rows)
    ts2d = ts2d.astype(jnp.float32)
    if b_pad != B:
        ts2d = jnp.pad(ts2d, ((0, b_pad - B), (0, 0)))

    kernel = functools.partial(_onehot_kernel,
                               inv_log_base=1.0 / math.log(base),
                               max_k=max_k,
                               compute_intervals=compute_intervals)
    return pl.pallas_call(
        kernel,
        out_shape=jax.ShapeDtypeStruct((k1, b_pad, T), out_dtype),
        grid=(b_pad // rows,),
        in_specs=[pl.BlockSpec((rows, T), lambda b: (b, 0))],
        out_specs=pl.BlockSpec((k1, rows, T), lambda b: (0, b, 0)),
        compiler_params=pltpu.CompilerParams(
            dimension_semantics=("parallel",)),
    )(ts2d)


def one_hot_intervals(timestamps: jax.Array = None, base: int = 2,
                      max_k: int = 10, *, time_itvls: jax.Array = None,
                      block_rows=None, out_dtype=jnp.float32) -> jax.Array:
    """Module-faithful wrapper: [B, T, 1] timestamps -> [B, T, max_k+1]."""
    src = timestamps if time_itvls is None else time_itvls
    B, T = src.shape[0], src.shape[1]
    ts2d = src.reshape(B, T)               # torch.squeeze(dim=2) equivalent
    out_kmaj = one_hot_intervals_kmajor(
        ts2d, base=base, max_k=max_k,
        compute_intervals=time_itvls is None,
        block_rows=block_rows, out_dtype=out_dtype)
    # Present the module's [B, T, k1] layout; consumers that can work with the
    # lane-dense class-major [k1, B, T] should use one_hot_intervals_kmajor.
    return jnp.transpose(out_kmaj[:, :B, :], (1, 2, 0))


def _reference(timestamps: jax.Array, base: int = 2, max_k: int = 10) -> jax.Array:
    """Plain-JAX reference mirroring the PyTorch module (same arithmetic
    formulation as the kernel: * 1/log(base) is ulp-equivalent to / log(base))."""
    ts = timestamps[..., 0].astype(jnp.float32)                       # [B, T]
    itvl = jnp.concatenate([jnp.zeros_like(ts[:, :1]), ts[:, 1:] - ts[:, :-1]],
                           axis=1)
    res = jnp.log(itvl) * jnp.float32(1.0 / math.log(base))
    res = jnp.where(jnp.isnan(res), jnp.zeros_like(res), res)
    bucket = jnp.clip(jnp.floor(res), 0.0, float(max_k)).astype(jnp.int32)
    return jax.nn.one_hot(bucket, max_k + 1, dtype=jnp.float32)


if __name__ == "__main__":
    B, T = 2, 16
    base, max_k = 2, 10

    key = jax.random.PRNGKey(0)
    # strictly increasing timestamps: cumulative sum of positive deltas spread
    # widely enough to hit several log-base-2 buckets.
    deltas = jax.random.uniform(key, (B, T), minval=0.5, maxval=300.0,
                                dtype=jnp.float32)
    timestamps = jnp.cumsum(deltas, axis=1)[..., None]                # [B, T, 1]

    out = jax.block_until_ready(one_hot_intervals(timestamps, base=base, max_k=max_k))
    ref = _reference(timestamps, base=base, max_k=max_k)

    assert out.shape == (B, T, max_k + 1), out.shape
    assert out.dtype == jnp.float32, out.dtype
    assert bool(jnp.all(out == ref)), "Pallas kernel mismatch vs JAX reference"
    print("KERNEL_OK")
</pallas_src>

<mosaic_0001>
module attributes {stable_mosaic.version = 11 : i64} {
  func.func @_onehot_kernel(%arg0: i32, %arg1: memref<2x16xf32, #tpu.memory_space<vmem>>, %arg2: memref<11x2x16xf32, #tpu.memory_space<vmem>>) attributes {dimension_semantics = [#tpu.dimension_semantics<parallel>], iteration_bounds = array<i64: 1>, scalar_prefetch = 0 : i64, scratch_operands = 0 : i64, tpu.core_type = #tpu.core_type<tc>, window_params = [{transform_indices = @transform_0, window_bounds = array<i64: 2, 16>}, {transform_indices = @transform_1, window_bounds = array<i64: 11, 2, 16>}]} {
    %c0 = arith.constant 0 : index
    %c0_0 = arith.constant 0 : index
    %0 = vector.load %arg1[%c0, %c0_0] : memref<2x16xf32, #tpu.memory_space<vmem>>, vector<2x16xf32>
    %1 = vector.extract_strided_slice %0 {offsets = [0, 0], sizes = [2, 1], strides = [1, 1]} : vector<2x16xf32> to vector<2x1xf32>
    %2 = vector.extract_strided_slice %0 {offsets = [0, 0], sizes = [2, 15], strides = [1, 1]} : vector<2x16xf32> to vector<2x15xf32>
    %3 = tpu.concatenate %1, %2 in 1 : vector<2x1xf32>, vector<2x15xf32> -> vector<2x16xf32>
    %4 = tpu.iota {dimensions = array<i32: 1>} : vector<2x16xi32>
    %c0_i32 = arith.constant 0 : i32
    %5 = vector.broadcast %c0_i32 : i32 to vector<2x16xi32>
    %6 = arith.cmpi eq, %4, %5 : vector<2x16xi32>
    %7 = arith.subf %0, %3 : vector<2x16xf32>
    %cst = arith.constant 0.000000e+00 : f32
    %8 = vector.broadcast %cst : f32 to vector<2x16xf32>
    %9 = arith.select %6, %8, %7 : vector<2x16xi1>, vector<2x16xf32>
    %10 = math.log %9 : vector<2x16xf32>
    %cst_1 = arith.constant 1.44269502 : f32
    %11 = vector.broadcast %cst_1 : f32 to vector<2x16xf32>
    %12 = arith.mulf %10, %11 : vector<2x16xf32>
    %13 = arith.cmpf one, %12, %12 : vector<2x16xf32>
    %cst_2 = arith.constant 0.000000e+00 : f32
    %14 = vector.broadcast %cst_2 : f32 to vector<2x16xf32>
    %15 = arith.select %13, %14, %12 : vector<2x16xi1>, vector<2x16xf32>
    %16 = math.floor %15 : vector<2x16xf32>
    %cst_3 = arith.constant 0.000000e+00 : f32
    %cst_4 = arith.constant 1.000000e+01 : f32
    %17 = vector.broadcast %cst_3 : f32 to vector<2x16xf32>
    %18 = arith.maximumf %17, %16 : vector<2x16xf32>
    %19 = vector.broadcast %cst_4 : f32 to vector<2x16xf32>
    %20 = arith.minimumf %19, %18 : vector<2x16xf32>
    %21 = arith.fptosi %20 : vector<2x16xf32> to vector<2x16xi32>
    %c0_i32_5 = arith.constant 0 : i32
    %22 = vector.broadcast %c0_i32_5 : i32 to vector<2x16xi32>
    %23 = arith.cmpi eq, %21, %22 : vector<2x16xi32>
    %24 = arith.extui %23 : vector<2x16xi1> to vector<2x16xi32>
    %25 = arith.sitofp %24 : vector<2x16xi32> to vector<2x16xf32>
    %c0_6 = arith.constant 0 : index
    %c0_7 = arith.constant 0 : index
    %c0_8 = arith.constant 0 : index
    %26 = vector.load %arg2[%c0_6, %c0_7, %c0_8] : memref<11x2x16xf32, #tpu.memory_space<vmem>>, vector<1x2x16xf32>
    %27 = vector.shape_cast %26 : vector<1x2x16xf32> to vector<2x16xf32>
    %28 = vector.shape_cast %25 : vector<2x16xf32> to vector<1x2x16xf32>
    tpu.vector_store %arg2[%c0_6, %c0_7, %c0_8], %28 {strides = array<i32>} : memref<11x2x16xf32, #tpu.memory_space<vmem>>, vector<1x2x16xf32>,
    %c1_i32 = arith.constant 1 : i32
    %29 = vector.broadcast %c1_i32 : i32 to vector<2x16xi32>
    %30 = arith.cmpi eq, %21, %29 : vector<2x16xi32>
    %31 = arith.extui %30 : vector<2x16xi1> to vector<2x16xi32>
    %32 = arith.sitofp %31 : vector<2x16xi32> to vector<2x16xf32>
    %c1 = arith.constant 1 : index
    %c0_9 = arith.constant 0 : index
    %c0_10 = arith.constant 0 : index
    %33 = vector.load %arg2[%c1, %c0_9, %c0_10] : memref<11x2x16xf32, #tpu.memory_space<vmem>>, vector<1x2x16xf32>
    %34 = vector.shape_cast %33 : vector<1x2x16xf32> to vector<2x16xf32>
    %35 = vector.shape_cast %32 : vector<2x16xf32> to vector<1x2x16xf32>
    tpu.vector_store %arg2[%c1, %c0_9, %c0_10], %35 {strides = array<i32>} : memref<11x2x16xf32, #tpu.memory_space<vmem>>, vector<1x2x16xf32>,
    %c2_i32 = arith.constant 2 : i32
    %36 = vector.broadcast %c2_i32 : i32 to vector<2x16xi32>
    %37 = arith.cmpi eq, %21, %36 : vector<2x16xi32>
    %38 = arith.extui %37 : vector<2x16xi1> to vector<2x16xi32>
    %39 = arith.sitofp %38 : vector<2x16xi32> to vector<2x16xf32>
    %c2 = arith.constant 2 : index
    %c0_11 = arith.constant 0 : index
    %c0_12 = arith.constant 0 : index
    %40 = vector.load %arg2[%c2, %c0_11, %c0_12] : memref<11x2x16xf32, #tpu.memory_space<vmem>>, vector<1x2x16xf32>
    %41 = vector.shape_cast %40 : vector<1x2x16xf32> to vector<2x16xf32>
    %42 = vector.shape_cast %39 : vector<2x16xf32> to vector<1x2x16xf32>
    tpu.vector_store %arg2[%c2, %c0_11, %c0_12], %42 {strides = array<i32>} : memref<11x2x16xf32, #tpu.memory_space<vmem>>, vector<1x2x16xf32>,
    %c3_i32 = arith.constant 3 : i32
    %43 = vector.broadcast %c3_i32 : i32 to vector<2x16xi32>
    %44 = arith.cmpi eq, %21, %43 : vector<2x16xi32>
    %45 = arith.extui %44 : vector<2x16xi1> to vector<2x16xi32>
    %46 = arith.sitofp %45 : vector<2x16xi32> to vector<2x16xf32>
    %c3 = arith.constant 3 : index
    %c0_13 = arith.constant 0 : index
    %c0_14 = arith.constant 0 : index
    %47 = vector.load %arg2[%c3, %c0_13, %c0_14] : memref<11x2x16xf32, #tpu.memory_space<vmem>>, vector<1x2x16xf32>
    %48 = vector.shape_cast %47 : vector<1x2x16xf32> to vector<2x16xf32>
    %49 = vector.shape_cast %46 : vector<2x16xf32> to vector<1x2x16xf32>
    tpu.vector_store %arg2[%c3, %c0_13, %c0_14], %49 {strides = array<i32>} : memref<11x2x16xf32, #tpu.memory_space<vmem>>, vector<1x2x16xf32>,
    %c4_i32 = arith.constant 4 : i32
    %50 = vector.broadcast %c4_i32 : i32 to vector<2x16xi32>
    %51 = arith.cmpi eq, %21, %50 : vector<2x16xi32>
    %52 = arith.extui %51 : vector<2x16xi1> to vector<2x16xi32>
    %53 = arith.sitofp %52 : vector<2x16xi32> to vector<2x16xf32>
    %c4 = arith.constant 4 : index
    %c0_15 = arith.constant 0 : index
    %c0_16 = arith.constant 0 : index
    %54 = vector.load %arg2[%c4, %c0_15, %c0_16] : memref<11x2x16xf32, #tpu.memory_space<vmem>>, vector<1x2x16xf32>
    %55 = vector.shape_cast %54 : vector<1x2x16xf32> to vector<2x16xf32>
    %56 = vector.shape_cast %53 : vector<2x16xf32> to vector<1x2x16xf32>
    tpu.vector_store %arg2[%c4, %c0_15, %c0_16], %56 {strides = array<i32>} : memref<11x2x16xf32, #tpu.memory_space<vmem>>, vector<1x2x16xf32>,
    %c5_i32 = arith.constant 5 : i32
    %57 = vector.broadcast %c5_i32 : i32 to vector<2x16xi32>
    %58 = arith.cmpi eq, %21, %57 : vector<2x16xi32>
    %59 = arith.extui %58 : vector<2x16xi1> to vector<2x16xi32>
    %60 = arith.sitofp %59 : vector<2x16xi32> to vector<2x16xf32>
    %c5 = arith.constant 5 : index
    %c0_17 = arith.constant 0 : index
    %c0_18 = arith.constant 0 : index
    %61 = vector.load %arg2[%c5, %c0_17, %c0_18] : memref<11x2x16xf32, #tpu.memory_space<vmem>>, vector<1x2x16xf32>
    %62 = vector.shape_cast %61 : vector<1x2x16xf32> to vector<2x16xf32>
    %63 = vector.shape_cast %60 : vector<2x16xf32> to vector<1x2x16xf32>
    tpu.vector_store %arg2[%c5, %c0_17, %c0_18], %63 {strides = array<i32>} : memref<11x2x16xf32, #tpu.memory_space<vmem>>, vector<1x2x16xf32>,
    %c6_i32 = arith.constant 6 : i32
    %64 = vector.broadcast %c6_i32 : i32 to vector<2x16xi32>
    %65 = arith.cmpi eq, %21, %64 : vector<2x16xi32>
    %66 = arith.extui %65 : vector<2x16xi1> to vector<2x16xi32>
    %67 = arith.sitofp %66 : vector<2x16xi32> to vector<2x16xf32>
    %c6 = arith.constant 6 : index
    %c0_19 = arith.constant 0 : index
    %c0_20 = arith.constant 0 : index
    %68 = vector.load %arg2[%c6, %c0_19, %c0_20] : memref<11x2x16xf32, #tpu.memory_space<vmem>>, vector<1x2x16xf32>
    %69 = vector.shape_cast %68 : vector<1x2x16xf32> to vector<2x16xf32>
    %70 = vector.shape_cast %67 : vector<2x16xf32> to vector<1x2x16xf32>
    tpu.vector_store %arg2[%c6, %c0_19, %c0_20], %70 {strides = array<i32>} : memref<11x2x16xf32, #tpu.memory_space<vmem>>, vector<1x2x16xf32>,
    %c7_i32 = arith.constant 7 : i32
    %71 = vector.broadcast %c7_i32 : i32 to vector<2x16xi32>
    %72 = arith.cmpi eq, %21, %71 : vector<2x16xi32>
    %73 = arith.extui %72 : vector<2x16xi1> to vector<2x16xi32>
    %74 = arith.sitofp %73 : vector<2x16xi32> to vector<2x16xf32>
    %c7 = arith.constant 7 : index
    %c0_21 = arith.constant 0 : index
    %c0_22 = arith.constant 0 : index
    %75 = vector.load %arg2[%c7, %c0_21, %c0_22] : memref<11x2x16xf32, #tpu.memory_space<vmem>>, vector<1x2x16xf32>
    %76 = vector.shape_cast %75 : vector<1x2x16xf32> to vector<2x16xf32>
    %77 = vector.shape_cast %74 : vector<2x16xf32> to vector<1x2x16xf32>
    tpu.vector_store %arg2[%c7, %c0_21, %c0_22], %77 {strides = array<i32>} : memref<11x2x16xf32, #tpu.memory_space<vmem>>, vector<1x2x16xf32>,
    %c8_i32 = arith.constant 8 : i32
    %78 = vector.broadcast %c8_i32 : i32 to vector<2x16xi32>
    %79 = arith.cmpi eq, %21, %78 : vector<2x16xi32>
    %80 = arith.extui %79 : vector<2x16xi1> to vector<2x16xi32>
    %81 = arith.sitofp %80 : vector<2x16xi32> to vector<2x16xf32>
    %c8 = arith.constant 8 : index
    %c0_23 = arith.constant 0 : index
    %c0_24 = arith.constant 0 : index
    %82 = vector.load %arg2[%c8, %c0_23, %c0_24] : memref<11x2x16xf32, #tpu.memory_space<vmem>>, vector<1x2x16xf32>
    %83 = vector.shape_cast %82 : vector<1x2x16xf32> to vector<2x16xf32>
    %84 = vector.shape_cast %81 : vector<2x16xf32> to vector<1x2x16xf32>
    tpu.vector_store %arg2[%c8, %c0_23, %c0_24], %84 {strides = array<i32>} : memref<11x2x16xf32, #tpu.memory_space<vmem>>, vector<1x2x16xf32>,
    %c9_i32 = arith.constant 9 : i32
    %85 = vector.broadcast %c9_i32 : i32 to vector<2x16xi32>
    %86 = arith.cmpi eq, %21, %85 : vector<2x16xi32>
    %87 = arith.extui %86 : vector<2x16xi1> to vector<2x16xi32>
    %88 = arith.sitofp %87 : vector<2x16xi32> to vector<2x16xf32>
    %c9 = arith.constant 9 : index
    %c0_25 = arith.constant 0 : index
    %c0_26 = arith.constant 0 : index
    %89 = vector.load %arg2[%c9, %c0_25, %c0_26] : memref<11x2x16xf32, #tpu.memory_space<vmem>>, vector<1x2x16xf32>
    %90 = vector.shape_cast %89 : vector<1x2x16xf32> to vector<2x16xf32>
    %91 = vector.shape_cast %88 : vector<2x16xf32> to vector<1x2x16xf32>
    tpu.vector_store %arg2[%c9, %c0_25, %c0_26], %91 {strides = array<i32>} : memref<11x2x16xf32, #tpu.memory_space<vmem>>, vector<1x2x16xf32>,
    %c10_i32 = arith.constant 10 : i32
    %92 = vector.broadcast %c10_i32 : i32 to vector<2x16xi32>
    %93 = arith.cmpi eq, %21, %92 : vector<2x16xi32>
    %94 = arith.extui %93 : vector<2x16xi1> to vector<2x16xi32>
    %95 = arith.sitofp %94 : vector<2x16xi32> to vector<2x16xf32>
    %c10 = arith.constant 10 : index
    %c0_27 = arith.constant 0 : index
    %c0_28 = arith.constant 0 : index
    %96 = vector.load %arg2[%c10, %c0_27, %c0_28] : memref<11x2x16xf32, #tpu.memory_space<vmem>>, vector<1x2x16xf32>
    %97 = vector.shape_cast %96 : vector<1x2x16xf32> to vector<2x16xf32>
    %98 = vector.shape_cast %95 : vector<2x16xf32> to vector<1x2x16xf32>
    tpu.vector_store %arg2[%c10, %c0_27, %c0_28], %98 {strides = array<i32>} : memref<11x2x16xf32, #tpu.memory_space<vmem>>, vector<1x2x16xf32>,
    return
  }
  func.func @transform_0(%arg0: i32) -> (i32, i32) {
    %c0_i32 = arith.constant 0 : i32
    %c0_i32_0 = arith.constant 0 : i32
    return %arg0, %c0_i32 : i32, i32
  }
  func.func @transform_1(%arg0: i32) -> (i32, i32, i32) {
    %c0_i32 = arith.constant 0 : i32
    %c0_i32_0 = arith.constant 0 : i32
    %c0_i32_1 = arith.constant 0 : i32
    return %c0_i32, %arg0, %c0_i32_0 : i32, i32, i32
  }
}

</mosaic_0001>

<bundles_post_ra>
// kernel: tpu_custom_call.1
= control target key start
LH: loop header
LB: loop body
LE: loop exit
PB: predicated region body
PF: predicated region fallthrough
CT: control target
= control target key end

     0   :  { %6 = vsyncpa [#allocation3], 0  ;;  %s241_s0 = inlined_call_operand.hbm [shape: f32[2,16], index: 0, kind: input, shape index: {}]   ;;  %s242_s1 = inlined_call_operand.hbm [shape: f32[11,2,16], index: 1, kind: output, shape index: {}]  }
   0x1   :  { %7 = vsyncpa [#allocation4], 0  ;;  %s183_s6 = smov [#allocation2]   ;;  %s135_s10 = scalar_lea.hbm %s241_s0, 32 }
   0x2   :  { %s14_s7 = sshll.u32 %s183_s6, 4  ;;  %p136_p0 = scmp.ne.s32.totalorder %s241_s0, %s135_s10  ;;  %s15_s7 = int_to_ptr.vmem [resolvable:$true] %s14_s7 }
   0x3   :  { %p139_p1 = scmp.lt.u32.totalorder %s135_s10, %s241_s0 }
   0x5   :  { %p141_p2 = pnand %p139_p1, %p136_p0 }
   0x7   :  { %144 = shalt.err (!%p141_p2)
}
   0x8   :  { %s145_s15 = scalar_lea.vmem %s15_s7, 32  ;;  %p150_p4 = scmp.lt.s32.totalorder %s15_s7, %s15_s7 }
   0x9   :  { %p146_p3 = scmp.ne.s32.totalorder %s15_s7, %s145_s15  ;;  %p151_p5 = scmp.lt.s32.totalorder %s145_s15, %s145_s15 }
   0xb   :  { %p152_p6 = por %p151_p5, %p150_p4 }
   0xd   :  { %p153_p7 = pnand %p152_p6, %p146_p3 }
   0xf   :  { %156 = shalt.err (!%p153_p7)
}
  0x10   :  { %17 = dma.hbm_to_vmem [thread:$0]  %s241_s0, 32, %s15_s7, [#allocation3]  }
  0x11   :  { %179 = dma.done.wait [#allocation3], 32  }
  0x12   :  { %180 = vsyncadd [#allocation3], 4294967264  ;;  %v21_v0 = vld [vmem:[#allocation2] sm:$0x3]  ;;  %s184_s18 = smov 1   ;;  %v28_v1 = vlaneseq  ;;  %vm26_vm0 = vcmask 7168  }
  0x13   :  { %23 = vrot.lane.b32.xlu0 %v21_v0, %s184_s18  ;;  %vm45_vm3 = vcmask 123904   ;;  %s185_s0 = smov [#allocation5]   ;;  %v186_v16 = vmov 0.0  }
  0x14   :  { %v29_v2 = vand.u32 127, %v28_v1  ;;  %s102_s19 = sshll.u32 %s185_s0, 4  ;;  %s215_s19 = int_to_ptr.vmem [resolvable:$true] %s102_s19 }
  0x15   :  { %s157_s20 = scalar_lea.vmem %s215_s19, 352  ;;  %p162_p9 = scmp.lt.s32.totalorder %s215_s19, %s215_s19 }
  0x16   :  { %vm30_vm1 = vcmp.eq.s32.totalorder %v29_v2, 0  ;;  %p158_p8 = scmp.ne.s32.totalorder %s215_s19, %s157_s20  ;;  %p163_p10 = scmp.lt.s32.totalorder %s157_s20, %s157_s20 }
  0x18   :  { %p164_p11 = por %p163_p10, %p162_p9 }
  0x1a   :  { %p165_p12 = pnand %p164_p11, %p158_p8 }
  0x85   :  { %v24_v3 = vpop.permute.xlu0 %23 }
  0x86   :  { %v27_v4 = vsel %vm26_vm0, %v21_v0, %v24_v3 }
  0x87   :  { %v31_v5 = vsub.f32 %v21_v0, %v27_v4 }
  0x89   :  { %v32_v6 = vsel %vm30_vm1, 0.0, %v31_v5 }
  0x8a   :  { %133 = vlog2.f32 %v32_v6 }
  0x94   :  { %v134_v7 = vpop.eup %133 }
  0x95   :  { %v34_v8 = vmul.f32 0.6931472, %v134_v7 }
  0x97   :  { %v35_v9 = vmul.f32 1.442695, %v34_v8 }
  0x99   :  { %vm36_vm2 = vcmp.ne.f32.partialorder %v35_v9, %v35_v9 }
  0x9a   :  { %v37_v10 = vsel %vm36_vm2, 0.0, %v35_v9 }
  0x9b   :  { %v38_v11 = vfloor.f32 %v37_v10 }
  0x9d   :  { %v39_v12 = vmax.f32 %v38_v11, 0.0 }
  0x9f   :  { %v40_v13 = vmin.f32 %v39_v12, 10.0 }
  0xa1   :  { %v125_v14 = vtrunc.f32 %v40_v13 }
  0xa3   :  { %v126_v15 = vcvt.f32.s32 %v125_v14 }
  0xa5   :  { %vm42_vm4 = vcmp.eq.s32.totalorder %v126_v15, 0  ;;  %vm47_vm5 = vcmp.eq.s32.totalorder %v126_v15, 1  ;;  %vm52_vm6 = vcmp.eq.s32.totalorder %v126_v15, 2  ;;  %vm57_vm7 = vcmp.eq.s32.totalorder %v126_v15, 3 }
  0xa6   :  { %v114_v17 = vsel %vm42_vm4, 1.0, %v186_v16  ;;  %v115_v18 = vsel %vm47_vm5, 1.0, %v186_v16  ;;  %v116_v19 = vsel %vm52_vm6, 1.0, %v186_v16  ;;  %v117_v20 = vsel %vm57_vm7, 1.0, %v186_v16 }
  0xa7   :  { %46 = vst.msk [vmem:[#allocation5] sm:$0x3] %vm45_vm3, %v114_v17  ;;  %51 = vst.msk [vmem:[#allocation5 + $0x2] sm:$0x3] %vm45_vm3, %v115_v18  ;;  %vm62_vm8 = vcmp.eq.s32.totalorder %v126_v15, 4  ;;  %vm67_vm9 = vcmp.eq.s32.totalorder %v126_v15, 5 }
  0xa8   :  { %56 = vst.msk [vmem:[#allocation5 + $0x4] sm:$0x3] %vm45_vm3, %v116_v19  ;;  %61 = vst.msk [vmem:[#allocation5 + $0x6] sm:$0x3] %vm45_vm3, %v117_v20  ;;  %vm72_vm10 = vcmp.eq.s32.totalorder %v126_v15, 6  ;;  %vm77_vm11 = vcmp.eq.s32.totalorder %v126_v15, 7 }
  0xa9   :  { %v118_v21 = vsel %vm62_vm8, 1.0, %v186_v16  ;;  %v119_v22 = vsel %vm67_vm9, 1.0, %v186_v16  ;;  %v120_v23 = vsel %vm72_vm10, 1.0, %v186_v16  ;;  %v121_v24 = vsel %vm77_vm11, 1.0, %v186_v16 }
  0xaa   :  { %66 = vst.msk [vmem:[#allocation5 + $0x8] sm:$0x3] %vm45_vm3, %v118_v21  ;;  %71 = vst.msk [vmem:[#allocation5 + $0xa] sm:$0x3] %vm45_vm3, %v119_v22  ;;  %vm82_vm12 = vcmp.eq.s32.totalorder %v126_v15, 8  ;;  %vm87_vm13 = vcmp.eq.s32.totalorder %v126_v15, 9 }
  0xab   :  { %76 = vst.msk [vmem:[#allocation5 + $0xc] sm:$0x3] %vm45_vm3, %v120_v23  ;;  %81 = vst.msk [vmem:[#allocation5 + $0xe] sm:$0x3] %vm45_vm3, %v121_v24  ;;  %vm92_vm14 = vcmp.eq.s32.totalorder %v126_v15, 10  ;;  %v122_v25 = vsel %vm82_vm12, 1.0, %v186_v16 }
  0xac   :  { %v123_v26 = vsel %vm87_vm13, 1.0, %v186_v16  ;;  %v124_v27 = vsel %vm92_vm14, 1.0, %v186_v16  ;;  %86 = vst.msk [vmem:[#allocation5 + $0x10] sm:$0x3] %vm45_vm3, %v122_v25 }
  0xad   :  { %91 = vst.msk [vmem:[#allocation5 + $0x12] sm:$0x3] %vm45_vm3, %v123_v26  ;;  %96 = vst.msk [vmem:[#allocation5 + $0x14] sm:$0x3] %vm45_vm3, %v124_v27 }
  0xae   :  { %168 = shalt.err (!%p165_p12)
}
  0xaf   :  { %s169_s23 = scalar_lea.hbm %s242_s1, 352 }
  0xb0   :  { %p170_p13 = scmp.ne.s32.totalorder %s242_s1, %s169_s23  ;;  %p173_p0 = scmp.lt.u32.totalorder %s169_s23, %s242_s1 }
  0xb2   :  { %p175_p1 = pnand %p173_p0, %p170_p13 }
  0xb4   :  { %178 = shalt.err (!%p175_p1)
}
  0xb5   :  { %s187_s28 = smov 32   ;;  %s188_s29 = smov 2  }
  0xb6   :  { %108 = dma.vmem_to_hbm [thread:$0]  %s215_s19, 352, %s242_s1, [#allocation4], %s187_s28, %s187_s28, %s188_s29  }
  0xb7   :  { %181 = dma.done.wait [#allocation4], 352  }
  0xb8   :  { %182 = vsyncadd [#allocation4], 4294966944 }
  0xb9   :  { %112 = vsyncpa [#allocation3], 1 }
  0xba   :  { %113 = vsyncpa [#allocation4], 1 }

</bundles_post_ra>
